<compile_context>
chip_gen: v7x
topology: tpu7x:2x2x1
jax: 0.10.0
libtpu: 0.0.40
codegen_flags: <defaults>
</compile_context>

<pallas_src>
import functools

import jax
import jax.numpy as jnp
from jax.experimental import pallas as pl
from jax.experimental.pallas import tpu as pltpu


def _round_up(x, m):
    return ((x + m - 1) // m) * m


def _relu_cast(h_f32, cd, relu_after_cast):
    """ReLU + cast to compute dtype. Cast-then-max is numerically identical
    (cast is monotone, cast(0)=0) and halves VPU work on bf16-VALU chips."""
    if relu_after_cast:
        return jnp.maximum(h_f32.astype(cd), 0.0)
    return jnp.maximum(h_f32, 0.0).astype(cd)


def value_mlp_kernel(x_ref, w1_ref, w2_ref, w3_ref, o_ref, *, relu_after_cast):
    """One batch tile, feature-major: x_aug (D+1, bm) -> v^T (1, bm).

    Biases are already folded into the (augmented) weights; the last row of
    x_aug is ones and W1_aug/W2_aug carry that ones channel forward.
    """
    x = x_ref[...]                         # (D+1, bm), compute dtype
    cd = x.dtype

    # Layer 1 (+ bias via ones channel)
    h1 = jnp.dot(w1_ref[...], x, preferred_element_type=jnp.float32)   # (H1+1, bm)
    h1 = _relu_cast(h1, cd, relu_after_cast)

    # Layer 2 (+ bias via ones channel)
    h2 = jnp.dot(w2_ref[...], h1, preferred_element_type=jnp.float32)  # (H2+1, bm)
    h2 = _relu_cast(h2, cd, relu_after_cast)

    # Output layer (identity activation, bias folded)
    v = jnp.dot(w3_ref[...], h2, preferred_element_type=jnp.float32)   # (1, bm)
    o_ref[...] = v.astype(o_ref.dtype)     # lane-dense (1, bm) unmasked store


def _has_bf16_valu():
    """True on v6e/v7x (bf16 VALU); False on v2-v5 where cast-then-relu in bf16
    would add conversions."""
    try:
        kind = jax.devices()[0].device_kind.lower()
        return not any(tag in kind for tag in ("v2", "v3", "v4", "v5"))
    except Exception:
        return True


def value_network_forward(state, params, *, block_b=8192,
                          compute_dtype=jnp.bfloat16):
    """state: [B, D] float32 -> [B, 1] float32.

    Same forward semantics as the PyTorch ValueNetwork; with the default
    compute_dtype=bfloat16 the matmuls use bf16 MXU operands with f32
    accumulation.  Pass compute_dtype=jnp.float32 for exact f32 parity.
    """
    w1, b1 = params["w1"], params["b1"]
    w2, b2 = params["w2"], params["b2"]
    w3, b3 = params["w3"], params["b3"]
    B, D = state.shape
    H1, H2 = w1.shape[0], w2.shape[0]
    assert w1.shape == (H1, D) and w2.shape == (H2, H1) and w3.shape == (1, H2)
    assert b1.shape == (H1,) and b2.shape == (H2,) and b3.shape == (1,)

    cd = jnp.dtype(compute_dtype)
    relu_after_cast = (cd != jnp.dtype(jnp.float32)) and _has_bf16_valu()

    # ---- Fold biases into augmented weights (done once, outside the kernel) ----
    # W1_aug: (H1+1, D+1); extra column = b1, extra row selects the ones row of
    # x_aug so the "ones" channel survives layer 1 (relu(1)=1).
    w1_aug = jnp.concatenate(
        [jnp.concatenate([w1, b1[:, None]], axis=1),
         jnp.concatenate([jnp.zeros((1, D), w1.dtype),
                          jnp.ones((1, 1), w1.dtype)], axis=1)],
        axis=0).astype(cd)
    # W2_aug: (H2+1, H1+1); extra column = b2, extra row carries the ones channel.
    w2_aug = jnp.concatenate(
        [jnp.concatenate([w2, b2[:, None]], axis=1),
         jnp.concatenate([jnp.zeros((1, H1), w2.dtype),
                          jnp.ones((1, 1), w2.dtype)], axis=1)],
        axis=0).astype(cd)
    # W3_aug: (1, H2+1); extra column = b3.
    w3_aug = jnp.concatenate([w3, b3[:, None]], axis=1).astype(cd)

    # ---- Batch tiling --------------------------------------------------------
    block_b = max(128, _round_up(block_b, 128))
    bm = min(block_b, _round_up(B, 128))
    # v7x megacore: guarantee >= 2 grid steps for big batches so the "parallel"
    # axis shards across both TensorCores (harmless on single-TC v5e/v6e).
    if B >= 2048:
        bm = min(bm, max(1024, _round_up(pl.cdiv(B, 2), 128)))
    B_pad = _round_up(B, bm)
    grid = (B_pad // bm,)

    # ---- Feature-major, bias-augmented, pre-cast input -----------------------
    x_t = state.T.astype(cd)                                   # (D, B)
    if B_pad != B:
        x_t = jnp.pad(x_t, ((0, 0), (0, B_pad - B)))
    x_aug = jnp.concatenate([x_t, jnp.ones((1, B_pad), cd)], axis=0)  # (D+1, B_pad)

    # ---- VMEM budget (only set an explicit limit if we outgrow v5e's default) -
    itemsize = cd.itemsize
    vmem_est = (2 * (D + 1) * bm * itemsize          # double-buffered state tile
                + 2 * bm * 4                         # double-buffered (1, bm) f32 out
                + (w1_aug.size + w2_aug.size + w3_aug.size) * itemsize
                + (H1 + H2 + 2) * bm * (4 + itemsize))   # h1/h2 intermediates
    cp_kwargs = {}
    if vmem_est > 12 * (1 << 20):
        cp_kwargs["vmem_limit_bytes"] = int(min(vmem_est * 2, 48 * (1 << 20)))

    kernel = functools.partial(value_mlp_kernel, relu_after_cast=relu_after_cast)
    const = lambda i: (0, 0)   # weights: single block, fetched once, VMEM-resident

    out_t = pl.pallas_call(
        kernel,
        out_shape=jax.ShapeDtypeStruct((1, B_pad), jnp.float32),
        grid_spec=pltpu.PrefetchScalarGridSpec(
            num_scalar_prefetch=0,
            grid=grid,
            in_specs=[
                pl.BlockSpec((D + 1, bm), lambda i: (0, i)),       # state tile (pipelined)
                pl.BlockSpec((H1 + 1, D + 1), const),
                pl.BlockSpec((H2 + 1, H1 + 1), const),
                pl.BlockSpec((1, H2 + 1), const),
            ],
            out_specs=pl.BlockSpec((1, bm), lambda i: (0, i)),
        ),
        compiler_params=pltpu.CompilerParams(
            dimension_semantics=("parallel",), **cp_kwargs),
    )(x_aug, w1_aug, w2_aug, w3_aug)

    # (1, B_pad) -> (B, 1): free metadata reshape + slice off batch padding.
    return out_t.reshape(B_pad, 1)[:B]


def init_params(key, input_dims, hidden_sizes):
    """PyTorch nn.Linear default init (uniform +-1/sqrt(fan_in)); weights kept
    in the natural PyTorch [out, in] layout."""
    assert len(hidden_sizes) == 2, "kernel implements the 2-hidden-layer value MLP"
    sizes = [input_dims] + list(hidden_sizes) + [1]
    params = {}
    for j in range(len(sizes) - 1):
        fan_in, fan_out = sizes[j], sizes[j + 1]
        key, kw, kb = jax.random.split(key, 3)
        bound = 1.0 / float(fan_in) ** 0.5
        params[f"w{j + 1}"] = jax.random.uniform(
            kw, (fan_out, fan_in), jnp.float32, -bound, bound)
        params[f"b{j + 1}"] = jax.random.uniform(
            kb, (fan_out,), jnp.float32, -bound, bound)
    return params


def reference_forward(state, params, compute_dtype=jnp.float32):
    """Pure-JAX reference. Exact PyTorch semantics when compute_dtype=float32;
    with bfloat16 it mirrors the kernel's bf16-operand / f32-accumulate math."""
    cd = jnp.dtype(compute_dtype)

    def lin(x, w, b):
        return (jnp.dot(x.astype(cd), w.astype(cd).T,
                        preferred_element_type=jnp.float32)
                + b.astype(cd).astype(jnp.float32))

    h1 = jnp.maximum(lin(state, params["w1"], params["b1"]), 0.0)
    h2 = jnp.maximum(lin(h1, params["w2"], params["b2"]), 0.0)
    return lin(h2, params["w3"], params["b3"])


if __name__ == "__main__":
    # Small shapes consistent with a 2-DOF SAC value network:
    # batch=8, state dim=8, hidden_sizes=(32, 32), scalar value output.
    B, D = 8, 8
    hidden_sizes = (32, 32)

    key = jax.random.PRNGKey(0)
    key, kx = jax.random.split(key)
    state = jax.random.normal(kx, (B, D), jnp.float32)
    params = init_params(key, D, hidden_sizes)

    # Default bf16-MXU path.
    v = jax.block_until_ready(value_network_forward(state, params))
    assert v.shape == (B, 1)
    v_ref_bf16 = reference_forward(state, params, compute_dtype=jnp.bfloat16)
    v_ref_f32 = reference_forward(state, params, compute_dtype=jnp.float32)
    assert jnp.allclose(v, v_ref_bf16, atol=2e-2, rtol=2e-2)
    assert jnp.allclose(v, v_ref_f32, atol=5e-2, rtol=5e-2)

    # Exact-parity float32 path (kept available per correctness review).
    v32 = jax.block_until_ready(
        value_network_forward(state, params, compute_dtype=jnp.float32))
    assert v32.shape == (B, 1)
    assert jnp.allclose(v32, v_ref_f32, atol=1e-3, rtol=1e-3)

    # Ragged batch exercising multi-step "parallel" grid + padding slice-off.
    B2 = 2500
    key, kx2 = jax.random.split(key)
    state2 = jax.random.normal(kx2, (B2, D), jnp.float32)
    v2 = jax.block_until_ready(value_network_forward(state2, params))
    assert v2.shape == (B2, 1)
    v2_ref = reference_forward(state2, params, compute_dtype=jnp.bfloat16)
    assert jnp.allclose(v2, v2_ref, atol=2e-2, rtol=2e-2)

    print("KERNEL_OK")
</pallas_src>

<mosaic_0001>
module attributes {stable_mosaic.version = 11 : i64} {
  func.func @value_mlp_kernel(%arg0: i32, %arg1: memref<9x128xbf16, #tpu.memory_space<vmem>>, %arg2: memref<33x9xbf16, #tpu.memory_space<vmem>>, %arg3: memref<33x33xbf16, #tpu.memory_space<vmem>>, %arg4: memref<1x33xbf16, #tpu.memory_space<vmem>>, %arg5: memref<1x128xf32, #tpu.memory_space<vmem>>) attributes {dimension_semantics = [#tpu.dimension_semantics<parallel>], iteration_bounds = array<i64: 1>, scalar_prefetch = 0 : i64, scratch_operands = 0 : i64, tpu.core_type = #tpu.core_type<tc>, window_params = [{transform_indices = @transform_0, window_bounds = array<i64: 9, 128>}, {pipeline_mode = #tpu.pipeline_mode<synchronous>, transform_indices = @transform_1, window_bounds = array<i64: 33, 9>}, {pipeline_mode = #tpu.pipeline_mode<synchronous>, transform_indices = @transform_2, window_bounds = array<i64: 33, 33>}, {pipeline_mode = #tpu.pipeline_mode<synchronous>, transform_indices = @transform_3, window_bounds = array<i64: 1, 33>}, {transform_indices = @transform_4, window_bounds = array<i64: 1, 128>}]} {
    %c0 = arith.constant 0 : index
    %c0_0 = arith.constant 0 : index
    %0 = vector.load %arg1[%c0, %c0_0] : memref<9x128xbf16, #tpu.memory_space<vmem>>, vector<9x128xbf16>
    %c0_1 = arith.constant 0 : index
    %c0_2 = arith.constant 0 : index
    %1 = vector.load %arg2[%c0_1, %c0_2] : memref<33x9xbf16, #tpu.memory_space<vmem>>, vector<33x9xbf16>
    %cst = arith.constant dense<0.000000e+00> : vector<33x128xf32>
    %2 = tpu.matmul %1, %0, %cst {dimension_numbers = #tpu.dot_dimension_numbers<[1], [0], [0], [1], [0, 0, 1, 1], [], []>} : vector<33x9xbf16>, vector<9x128xbf16>, vector<33x128xf32> -> vector<33x128xf32>
    %3 = arith.truncf %2 : vector<33x128xf32> to vector<33x128xbf16>
    %cst_3 = arith.constant 0.000000e+00 : bf16
    %4 = vector.broadcast %cst_3 : bf16 to vector<33x128xbf16>
    %5 = arith.maximumf %3, %4 : vector<33x128xbf16>
    %c0_4 = arith.constant 0 : index
    %c0_5 = arith.constant 0 : index
    %6 = vector.load %arg3[%c0_4, %c0_5] : memref<33x33xbf16, #tpu.memory_space<vmem>>, vector<33x33xbf16>
    %cst_6 = arith.constant dense<0.000000e+00> : vector<33x128xf32>
    %7 = tpu.matmul %6, %5, %cst_6 {dimension_numbers = #tpu.dot_dimension_numbers<[1], [0], [0], [1], [0, 0, 1, 1], [], []>} : vector<33x33xbf16>, vector<33x128xbf16>, vector<33x128xf32> -> vector<33x128xf32>
    %8 = arith.truncf %7 : vector<33x128xf32> to vector<33x128xbf16>
    %cst_7 = arith.constant 0.000000e+00 : bf16
    %9 = vector.broadcast %cst_7 : bf16 to vector<33x128xbf16>
    %10 = arith.maximumf %8, %9 : vector<33x128xbf16>
    %c0_8 = arith.constant 0 : index
    %c0_9 = arith.constant 0 : index
    %11 = vector.load %arg4[%c0_8, %c0_9] : memref<1x33xbf16, #tpu.memory_space<vmem>>, vector<1x33xbf16>
    %cst_10 = arith.constant dense<0.000000e+00> : vector<1x128xf32>
    %12 = tpu.matmul %11, %10, %cst_10 {dimension_numbers = #tpu.dot_dimension_numbers<[1], [0], [0], [1], [0, 0, 1, 1], [], []>} : vector<1x33xbf16>, vector<33x128xbf16>, vector<1x128xf32> -> vector<1x128xf32>
    %c0_11 = arith.constant 0 : index
    %c0_12 = arith.constant 0 : index
    %13 = vector.load %arg5[%c0_11, %c0_12] : memref<1x128xf32, #tpu.memory_space<vmem>>, vector<1x128xf32>
    tpu.vector_store %arg5[%c0_11, %c0_12], %12 {strides = array<i32>} : memref<1x128xf32, #tpu.memory_space<vmem>>, vector<1x128xf32>,
    return
  }
  func.func @transform_0(%arg0: i32) -> (i32, i32) {
    %c0_i32 = arith.constant 0 : i32
    %c0_i32_0 = arith.constant 0 : i32
    return %c0_i32, %arg0 : i32, i32
  }
  func.func @transform_1(%arg0: i32) -> (i32, i32) {
    %c0_i32 = arith.constant 0 : i32
    %c0_i32_0 = arith.constant 0 : i32
    %c0_i32_1 = arith.constant 0 : i32
    return %c0_i32, %c0_i32_0 : i32, i32
  }
  func.func @transform_2(%arg0: i32) -> (i32, i32) {
    %c0_i32 = arith.constant 0 : i32
    %c0_i32_0 = arith.constant 0 : i32
    %c0_i32_1 = arith.constant 0 : i32
    return %c0_i32, %c0_i32_0 : i32, i32
  }
  func.func @transform_3(%arg0: i32) -> (i32, i32) {
    %c0_i32 = arith.constant 0 : i32
    %c0_i32_0 = arith.constant 0 : i32
    %c0_i32_1 = arith.constant 0 : i32
    return %c0_i32, %c0_i32_0 : i32, i32
  }
  func.func @transform_4(%arg0: i32) -> (i32, i32) {
    %c0_i32 = arith.constant 0 : i32
    %c0_i32_0 = arith.constant 0 : i32
    return %c0_i32, %arg0 : i32, i32
  }
}

</mosaic_0001>

<bundles_post_ra>
// kernel: tpu_custom_call.1
= control target key start
LH: loop header
LB: loop body
LE: loop exit
PB: predicated region body
PF: predicated region fallthrough
CT: control target
= control target key end

     0   :  { %vm54_vm0 = vcmask 1043456   ;;  %v387_v0 = vmov 0.0   ;;  %vm55_vm1 = vcmask 1044480   ;;  %v388_v2 = vmov 65535   ;;  %s478_s0 = inlined_call_operand.vmem [shape: bf16[9,128], index: 0, kind: input, shape index: {}]   ;;  %s479_s1 = inlined_call_operand.vmem [shape: bf16[33,9], index: 1, kind: input, shape index: {}]   ;;  %s480_s2 = inlined_call_operand.vmem [shape: bf16[33,33], index: 2, kind: input, shape index: {}]   ;;  %s481_s3 = inlined_call_operand.vmem [shape: bf16[1,33], index: 3, kind: input, shape index: {}]   ;;  %s482_s4 = inlined_call_operand.hbm [shape: f32[1,128], index: 4, kind: output, shape index: {}]  }
   0x1   :  { %309 = vmatprep.subr.bf16.mxu0 %v387_v0  ;;  %v356_v1 = vld [vmem:[%s478_s0] sm:$0x1f]   ;;  %323 = vmatprep.subr.bf16.mxu1 %v387_v0  ;;  %v56_v3 = vsel %vm54_vm0, 4294967295, %v388_v2  ;;  %vm389_vm2 = vmmov 0   ;;  %vm44_vm3 = vcmask 72704  }
   0x2   :  { %311 = vmatprep.mubr.msk.bf16.mxu0 %vm389_vm2, %v387_v0  ;;  %329 = vmatprep.mubr.msk.bf16.mxu1 %vm389_vm2, %v387_v0  ;;  %v57_v4 = vsel %vm55_vm1, %v56_v3, 0  ;;  %v357_v6 = vld [vmem:[%s479_s1] sm:$0xff]  }
   0x3   :  { %v59_v5 = vand.u32 %v356_v1, %v57_v4 }
   0x5   :  { %310 = vmatpush3.bf16.msra.mxu0 %v59_v5 }
   0x6   :  { %9 = vsyncpa [#allocation3], 0  ;;  %341 = vmatprep.subr.bf16.mxu0 %v387_v0  ;;  %v358_v7 = vld [vmem:[%s479_s1 + $0x8] sm:$0xff]   ;;  %v359_v8 = vld [vmem:[%s479_s1 + $0x10] ss:$0 sps:$4 sm:$0x11]  }
   0x7   :  { %v390_v14 = vmov 0   ;;  %vm151_vm4 = vcmask 1040384   ;;  %v360_v30 = vld [vmem:[%s480_s2] sm:$0xff]   ;;  %vm141_vm5 = vcmask 269312   ;;  %v361_v31 = vld [vmem:[%s480_s2 + $0x8] sm:$0xff]   ;;  %s391_s28 = smov [#allocation2]  }
   0x8   :  { %312 = vmatmul.mubr.msk.bf16.vlgmr.msra.gmra.mrb[0].mxu0 %vm44_vm3, %v357_v6  ;;  %v153_v26 = vsel %vm151_vm4, 65535, %v390_v14  ;;  %v362_v32 = vld [vmem:[%s480_s2 + $0x10] ss:$0 sps:$4 sm:$0x11]   ;;  %v219_v52 = vld [vmem:[%s481_s3] sm:$0x1] }
   0x9   :  { %315 = vmatprep.mubr.msk.bf16.mxu0 %vm389_vm2, %v387_v0  ;;  %s273_s29 = sshll.u32 %s391_s28, 4  ;;  %s274_s29 = int_to_ptr.vmem [resolvable:$true] %s273_s29 }
   0xa   :  { %s363_s30 = scalar_lea.vmem %s274_s29, 16  ;;  %s367_s5 = scalar_lea.vmem %s274_s29, 32 }
   0xb   :  { %p364_p0 = scmp.ne.s32.totalorder %s274_s29, %s363_s30  ;;  %p368_p1 = scmp.lt.s32.totalorder %s274_s29, %s274_s29 }
   0xc   :  { %p369_p2 = scmp.lt.s32.totalorder %s367_s5, %s363_s30 }
   0xe   :  { %p370_p3 = por %p369_p2, %p368_p1 }
  0x10   :  { %316 = vmatmul.mubr.msk.bf16.gmra.mrb[4].mxu0 %vm44_vm3, %v358_v7  ;;  %p371_p4 = pnand %p370_p3, %p364_p0 }
  0x11   :  { %319 = vmatprep.mubr.msk.bf16.mxu0 %vm389_vm2, %v387_v0 }
  0x18   :  { %320 = vmatmul.mubr.msk.bf16.gmra.mrb[8].mxu0 %vm44_vm3, %v359_v8 }
  0x19   :  { %347 = vmatprep.mubr.msk.bf16.mxu0 %vm389_vm2, %v387_v0 }
  0xdb   :  { %v95_v9 = vpop.f32.mrb[0].mxu0 }
  0xdc   :  { %v313_v10 = vpop.f32.mrb[1].mxu0 }
  0xdd   :  { %v98_v11 = vpop.f32.mrb[2].mxu0 }
  0xde   :  { %v117_v12 = vpack.c.bf16 %v98_v11, %v95_v9  ;;  %v314_v13 = vpop.f32.mrb[3].mxu0 }
  0xe0   :  { %v120_v15 = vmax.bf16 %v390_v14, %v117_v12 }
  0xe2   :  { %324 = vmatpush3.bf16.msra.mxu1 %v120_v15 }
  0xe3   :  { %v103_v16 = vpop.f32.mrb[4].mxu0  ;;  %325 = vmatprep.subr.bf16.mxu1 %v387_v0 }
  0xe4   :  { %v317_v17 = vpop.f32.mrb[5].mxu0 }
  0xe5   :  { %v106_v18 = vpop.f32.mrb[6].mxu0 }
  0xe6   :  { %v118_v19 = vpack.c.bf16 %v106_v18, %v103_v16  ;;  %v318_v20 = vpop.f32.mrb[7].mxu0 }
  0xe8   :  { %v121_v21 = vmax.bf16 %v390_v14, %v118_v19 }
  0xea   :  { %326 = vmatpush3.bf16.msra.mxu1 %v121_v21 }
  0xeb   :  { %v111_v22 = vpop.f32.mrb[8].mxu0  ;;  %327 = vmatprep.subr.bf16.mxu1 %v387_v0 }
  0xec   :  { %v119_v23 = vpack.c.bf16 %v111_v22, %v111_v22  ;;  %v321_v24 = vpop.f32.mrb[9].mxu0 }
  0xed   :  { %v114_v25 = vpop.f32.mrb[10].mxu0 }
  0xee   :  { %v122_v27 = vmax.bf16 %v390_v14, %v119_v23  ;;  %v322_v28 = vpop.f32.mrb[11].mxu0 }
  0xf0   :  { %v155_v29 = vand.u32 %v153_v26, %v122_v27 }
  0xf2   :  { %328 = vmatpush3.bf16.msra.mxu1 %v155_v29 }
  0xf5   :  { %330 = vmatmul.mubr.msk.bf16.vlgmr.msra.gmra.mrb[0].mxu1 %vm141_vm5, %v360_v30 }
  0xf6   :  { %333 = vmatprep.mubr.msk.bf16.mxu1 %vm389_vm2, %v387_v0 }
  0xfd   :  { %334 = vmatmul.mubr.msk.bf16.gmra.mrb[4].mxu1 %vm141_vm5, %v361_v31 }
  0xfe   :  { %337 = vmatprep.mubr.msk.bf16.mxu1 %vm389_vm2, %v387_v0 }
 0x105   :  { %338 = vmatmul.mubr.msk.bf16.gmra.mrb[8].mxu1 %vm141_vm5, %v362_v32 }
 0x1c8   :  { %v191_v33 = vpop.f32.mrb[0].mxu1 }
 0x1c9   :  { %v331_v34 = vpop.f32.mrb[1].mxu1 }
 0x1ca   :  { %v194_v35 = vpop.f32.mrb[2].mxu1 }
 0x1cb   :  { %v213_v36 = vpack.c.bf16 %v194_v35, %v191_v33  ;;  %v332_v37 = vpop.f32.mrb[3].mxu1 }
 0x1cd   :  { %v216_v38 = vmax.bf16 %v390_v14, %v213_v36 }
 0x1cf   :  { %342 = vmatpush3.bf16.msra.mxu0 %v216_v38 }
 0x1d0   :  { %v199_v39 = vpop.f32.mrb[4].mxu1  ;;  %343 = vmatprep.subr.bf16.mxu0 %v387_v0 }
 0x1d1   :  { %v335_v40 = vpop.f32.mrb[5].mxu1 }
 0x1d2   :  { %v202_v41 = vpop.f32.mrb[6].mxu1 }
 0x1d3   :  { %v214_v42 = vpack.c.bf16 %v202_v41, %v199_v39  ;;  %v336_v43 = vpop.f32.mrb[7].mxu1 }
 0x1d5   :  { %v217_v44 = vmax.bf16 %v390_v14, %v214_v42 }
 0x1d7   :  { %344 = vmatpush3.bf16.msra.mxu0 %v217_v44 }
 0x1d8   :  { %v207_v45 = vpop.f32.mrb[8].mxu1  ;;  %345 = vmatprep.subr.bf16.mxu0 %v387_v0 }
 0x1d9   :  { %v215_v46 = vpack.c.bf16 %v207_v45, %v207_v45  ;;  %v339_v47 = vpop.f32.mrb[9].mxu1 }
 0x1da   :  { %v210_v48 = vpop.f32.mrb[10].mxu1 }
 0x1db   :  { %v218_v49 = vmax.bf16 %v390_v14, %v215_v46  ;;  %v340_v50 = vpop.f32.mrb[11].mxu1 }
 0x1dd   :  { %v224_v51 = vand.u32 %v218_v49, %v153_v26 }
 0x1df   :  { %346 = vmatpush3.bf16.msra.mxu0 %v224_v51 }
 0x1e2   :  { %348 = vmatmul.mubr.msk.bf16.vlgmr.msra.gmra.mrb[12].mxu0 %vm141_vm5, %v219_v52 }
 0x2b5   :  { %v260_v53 = vpop.f32.mrb[12].mxu0 }
 0x2b6   :  { %266 = vst [vmem:[#allocation2] sm:$0x1] %v260_v53  ;;  %v349_v54 = vpop.f32.mrb[13].mxu0 }
 0x2b7   :  { %v263_v55 = vpop.f32.mrb[14].mxu0 }
 0x2b8   :  { %374 = shalt.err (!%p371_p4)
}
 0x2b9   :  { %s375_s3 = scalar_lea.hbm %s482_s4, 16 }
 0x2ba   :  { %p376_p5 = scmp.ne.s32.totalorder %s482_s4, %s375_s3  ;;  %p379_p6 = scmp.lt.u32.totalorder %s375_s3, %s482_s4 }
 0x2bc   :  { %p381_p7 = pnand %p379_p6, %p376_p5 }
 0x2be   :  { %384 = shalt.err (!%p381_p7)
}
 0x2bf   :  { %276 = dma.vmem_to_hbm [thread:$0]  %s274_s29, 16, %s482_s4, [#allocation3]   ;;  %v350_v56 = vpop.f32.mrb[15].mxu0 }
 0x2c0   :  { %385 = dma.done.wait [#allocation3], 16  }
 0x2c1   :  { %386 = vsyncadd [#allocation3], 4294967280 }
 0x2c2   :  { %280 = vsyncpa [#allocation3], 1 }

</bundles_post_ra>
